<compile_context>
chip_gen: v5e
topology: v5e:2x2
jax: 0.10.0
libtpu: 0.0.40
codegen_flags: <defaults>
</compile_context>

<pallas_src>
import functools

import jax
import jax.numpy as jnp
from jax.experimental import pallas as pl
from jax.experimental.pallas import tpu as pltpu

VOCAB = 32
HIDDEN = 32
COS_EPS = 1e-12  # additive eps on squared norms, as in aten::cosine_embedding_loss


# ---------------------------------------------------------------------------
# Shared in-kernel encoder body:
#   onehot(rows, V) @ fused_table(V, H) -> reshape(nb, S, H) -> max over S
# fused_table row 0 is zero (padding_idx=0), so pad tokens contribute the zero
# row before pooling and only the bias afterwards — identical to the reference
# (embedding(0)=0 -> Linear gives b -> max includes b).
# ---------------------------------------------------------------------------
def _lookup_pool(ids_flat, table, seq):
    rows, _ = ids_flat.shape                     # (nb*S, 1)
    v, h = table.shape
    iota_v = jax.lax.broadcasted_iota(jnp.int32, (rows, v), 1)
    onehot = (ids_flat == iota_v).astype(jnp.float32)                 # (rows, V)
    x = jnp.dot(onehot, table, preferred_element_type=jnp.float32)    # (rows, H)
    return jnp.max(x.reshape(rows // seq, seq, h), axis=1)            # (nb, H)


# ---------------------------------------------------------------------------
# Encoder-only kernel (x2 is None path): ids -> pooled embedding (TB, H)
# ---------------------------------------------------------------------------
def encoder_kernel(ids_ref, table_ref, bias_ref, out_ref, *, seq):
    pooled = _lookup_pool(ids_ref[...], table_ref[...], seq)
    out_ref[...] = pooled + bias_ref[...]        # bias after pool


@jax.jit
def pallas_encode(ids, table, bias2d):
    B, S = ids.shape
    V, H = table.shape
    ids_flat = ids.astype(jnp.int32).reshape(B * S, 1)
    TB = B  # single batch tile at small B; raise grid when B scales (TB*S % 8 == 0)
    return pl.pallas_call(
        functools.partial(encoder_kernel, seq=S),
        out_shape=jax.ShapeDtypeStruct((B, H), jnp.float32),
        grid=(B // TB,),
        in_specs=[
            pl.BlockSpec((TB * S, 1), lambda i: (i, 0)),
            pl.BlockSpec((V, H), lambda i: (0, 0)),
            pl.BlockSpec((1, H), lambda i: (0, 0)),
        ],
        out_specs=pl.BlockSpec((TB, H), lambda i: (i, 0)),
        compiler_params=pltpu.CompilerParams(dimension_semantics=("parallel",)),
    )(ids_flat, table, bias2d)


# ---------------------------------------------------------------------------
# Fused kernel: encode(x1) + encode(x2) + CosineEmbeddingLoss (margin=0, mean)
# Both sequences share ONE one-hot matmul; only the scalar loss leaves VMEM.
# ---------------------------------------------------------------------------
def fused_loss_kernel(ids_ref, y_ref, table_ref, bias_ref, out_ref, *, batch, seq):
    bias = bias_ref[...]                                               # (1, H)
    pooled = _lookup_pool(ids_ref[...], table_ref[...], seq)           # (2B, H)
    e1 = pooled[:batch] + bias                                         # (B, H)
    e2 = pooled[batch:] + bias                                         # (B, H)
    y = y_ref[...]                                                     # (B, 1) in {+1,-1}

    s12 = jnp.sum(e1 * e2, axis=-1, keepdims=True)                     # (B, 1)
    s11 = jnp.sum(e1 * e1, axis=-1, keepdims=True)
    s22 = jnp.sum(e2 * e2, axis=-1, keepdims=True)
    # PyTorch CosineEmbeddingLoss: prod / sqrt((||a||^2+eps)(||b||^2+eps))
    cos = s12 * jax.lax.rsqrt((s11 + COS_EPS) * (s22 + COS_EPS))

    per = jnp.where(y > 0.0, 1.0 - cos, jnp.maximum(cos, 0.0))         # margin = 0
    out_ref[0] = jnp.sum(per) * (1.0 / batch)                          # mean reduction


@jax.jit
def pallas_cos_embedding_loss_fused(ids1, ids2, label, table, bias2d):
    B, S = ids1.shape
    V, H = table.shape
    ids_flat = jnp.concatenate(
        [ids1.astype(jnp.int32).reshape(B * S, 1),
         ids2.astype(jnp.int32).reshape(B * S, 1)],
        axis=0,
    )                                                                  # (2*B*S, 1)
    y2d = label.astype(jnp.float32).reshape(B, 1)
    out = pl.pallas_call(
        functools.partial(fused_loss_kernel, batch=B, seq=S),
        out_shape=jax.ShapeDtypeStruct((1,), jnp.float32),
        grid=(1,),
        in_specs=[
            pl.BlockSpec((2 * B * S, 1), lambda i: (0, 0)),
            pl.BlockSpec((B, 1), lambda i: (0, 0)),
            pl.BlockSpec((V, H), lambda i: (0, 0)),
            pl.BlockSpec((1, H), lambda i: (0, 0)),
        ],
        out_specs=pl.BlockSpec(memory_space=pltpu.MemorySpace.SMEM),
    )(ids_flat, y2d, table, bias2d)
    return out[0]


# ---------------------------------------------------------------------------
# Model wrapper (parameter init + forward branching, mirrors Model.forward)
# ---------------------------------------------------------------------------
class PallasModel:
    def __init__(self, key, vocab_size=VOCAB, hidden_size=HIDDEN):
        k_emb, k_w, k_b = jax.random.split(key, 3)
        emb = jax.random.normal(k_emb, (vocab_size, hidden_size), jnp.float32)
        emb = emb.at[0].set(0.0)  # padding_idx=0
        bound = 1.0 / jnp.sqrt(hidden_size)
        w = jax.random.uniform(k_w, (hidden_size, hidden_size), jnp.float32, -bound, bound)
        b = jax.random.uniform(k_b, (hidden_size,), jnp.float32, -bound, bound)
        self.emb, self.w, self.b = emb, w, b
        # Fold Linear into the embedding table (static w.r.t. inputs):
        #   onehot @ emb @ W^T + b  ==  onehot @ (emb @ W^T) + b
        # Row 0 of the fused table stays zero (padding_idx).
        self.table = emb @ w.T                     # (V, H)
        self.bias2d = b.reshape(1, hidden_size)    # (1, H)

    def encode(self, ids):
        return pallas_encode(ids, self.table, self.bias2d)

    def __call__(self, x1, x2=None, label=None):
        if x2 is not None:
            # single fused kernel: both encodes + CosineEmbeddingLoss
            return pallas_cos_embedding_loss_fused(x1, x2, label, self.table, self.bias2d)
        return self.encode(x1)


if __name__ == "__main__":
    key = jax.random.PRNGKey(0)
    k_model, k_x1, k_x2, k_lab = jax.random.split(key, 4)

    B, S = 2, 8
    model = PallasModel(k_model)

    x1 = jax.random.randint(k_x1, (B, S), 0, VOCAB, dtype=jnp.int32)
    x2 = jax.random.randint(k_x2, (B, S), 0, VOCAB, dtype=jnp.int32)
    label = jnp.where(jax.random.bernoulli(k_lab, 0.5, (B,)), 1, -1).astype(jnp.int32)

    # encoder-only path
    enc = model(x1)
    enc = jax.block_until_ready(enc)
    assert enc.shape == (B, HIDDEN)

    # loss path (cosEmbedding_loss) — single fused pallas_call, one matmul
    loss = model(x1, x2, label)
    loss = jax.block_until_ready(loss)
    assert loss.shape == ()

    print("KERNEL_OK")
</pallas_src>

<mosaic_0001>
module attributes {stable_mosaic.version = 11 : i64} {
  func.func @encoder_kernel(%arg0: i32, %arg1: memref<16x1xi32, #tpu.memory_space<vmem>>, %arg2: memref<32x32xf32, #tpu.memory_space<vmem>>, %arg3: memref<1x32xf32, #tpu.memory_space<vmem>>, %arg4: memref<2x32xf32, #tpu.memory_space<vmem>>) attributes {dimension_semantics = [#tpu.dimension_semantics<parallel>], iteration_bounds = array<i64: 1>, scalar_prefetch = 0 : i64, scratch_operands = 0 : i64, tpu.core_type = #tpu.core_type<tc>, window_params = [{transform_indices = @transform_0, window_bounds = array<i64: 16, 1>}, {pipeline_mode = #tpu.pipeline_mode<synchronous>, transform_indices = @transform_1, window_bounds = array<i64: 32, 32>}, {pipeline_mode = #tpu.pipeline_mode<synchronous>, transform_indices = @transform_2, window_bounds = array<i64: 1, 32>}, {transform_indices = @transform_3, window_bounds = array<i64: 2, 32>}]} {
    %c0 = arith.constant 0 : index
    %c0_0 = arith.constant 0 : index
    %0 = vector.load %arg1[%c0, %c0_0] : memref<16x1xi32, #tpu.memory_space<vmem>>, vector<16x1xi32>
    %c0_1 = arith.constant 0 : index
    %c0_2 = arith.constant 0 : index
    %1 = vector.load %arg2[%c0_1, %c0_2] : memref<32x32xf32, #tpu.memory_space<vmem>>, vector<32x32xf32>
    %2 = tpu.iota {dimensions = array<i32: 1>} : vector<16x32xi32>
    %3 = vector.broadcast %0 : vector<16x1xi32> to vector<16x32xi32>
    %4 = arith.cmpi eq, %3, %2 : vector<16x32xi32>
    %5 = arith.extui %4 : vector<16x32xi1> to vector<16x32xi32>
    %6 = arith.sitofp %5 : vector<16x32xi32> to vector<16x32xf32>
    %cst = arith.constant dense<0.000000e+00> : vector<16x32xf32>
    %7 = tpu.matmul %6, %1, %cst {dimension_numbers = #tpu.dot_dimension_numbers<[1], [0], [0], [1], [0, 0, 1, 1], [], []>} : vector<16x32xf32>, vector<32x32xf32>, vector<16x32xf32> -> vector<16x32xf32>
    %8 = vector.shape_cast %7 : vector<16x32xf32> to vector<2x8x32xf32>
    %cst_3 = arith.constant dense<0xFF800000> : vector<2x32xf32>
    %9 = vector.multi_reduction <maximumf>, %8, %cst_3 [1] : vector<2x8x32xf32> to vector<2x32xf32>
    %c0_4 = arith.constant 0 : index
    %c0_5 = arith.constant 0 : index
    %10 = vector.load %arg3[%c0_4, %c0_5] : memref<1x32xf32, #tpu.memory_space<vmem>>, vector<1x32xf32>
    %11 = vector.broadcast %10 : vector<1x32xf32> to vector<2x32xf32>
    %12 = arith.addf %9, %11 : vector<2x32xf32>
    %c0_6 = arith.constant 0 : index
    %c0_7 = arith.constant 0 : index
    %13 = vector.load %arg4[%c0_6, %c0_7] : memref<2x32xf32, #tpu.memory_space<vmem>>, vector<2x32xf32>
    tpu.vector_store %arg4[%c0_6, %c0_7], %12 {strides = array<i32>} : memref<2x32xf32, #tpu.memory_space<vmem>>, vector<2x32xf32>,
    return
  }
  func.func @transform_0(%arg0: i32) -> (i32, i32) {
    %c0_i32 = arith.constant 0 : i32
    %c0_i32_0 = arith.constant 0 : i32
    return %arg0, %c0_i32 : i32, i32
  }
  func.func @transform_1(%arg0: i32) -> (i32, i32) {
    %c0_i32 = arith.constant 0 : i32
    %c0_i32_0 = arith.constant 0 : i32
    %c0_i32_1 = arith.constant 0 : i32
    return %c0_i32, %c0_i32_0 : i32, i32
  }
  func.func @transform_2(%arg0: i32) -> (i32, i32) {
    %c0_i32 = arith.constant 0 : i32
    %c0_i32_0 = arith.constant 0 : i32
    %c0_i32_1 = arith.constant 0 : i32
    return %c0_i32, %c0_i32_0 : i32, i32
  }
  func.func @transform_3(%arg0: i32) -> (i32, i32) {
    %c0_i32 = arith.constant 0 : i32
    %c0_i32_0 = arith.constant 0 : i32
    return %arg0, %c0_i32 : i32, i32
  }
}

</mosaic_0001>

<bundles_post_ra>
// kernel: pallas_encode.1
= control target key start
LH: loop header
LB: loop body
LE: loop exit
PB: predicated region body
PF: predicated region fallthrough
CT: control target
= control target key end

     0   :  { %8 = vsyncpa [#allocation3], 0  ;;  %s239_s0 = inlined_call_operand.vmem [shape: s32[16,1], index: 0, kind: input, shape index: {}]   ;;  %s240_s1 = inlined_call_operand.hbm [shape: f32[32,32], index: 1, kind: input, shape index: {}]   ;;  %s241_s2 = inlined_call_operand.vmem [shape: f32[1,32], index: 2, kind: input, shape index: {}]   ;;  %s242_s3 = inlined_call_operand.hbm [shape: f32[2,32], index: 3, kind: output, shape index: {}]  }
   0x1   :  { %9 = vsyncpa [#allocation4], 0  ;;  %s16_s14 = sshll.u32 %s240_s1, 4  ;;  %s194_s15 = smov [#allocation2]   ;;  %s17_s14 = int_to_ptr.hbm [resolvable:$true] %s16_s14 }
   0x2   :  { %s18_s16 = sshll.u32 %s194_s15, 4  ;;  %s195_s17 = smov 128   ;;  %s19_s16 = int_to_ptr.vmem [resolvable:$true] %s18_s16 }
   0x3   :  { %s196_s18 = smov 8  }
   0x4   :  { %24 = dma.hbm_to_vmem [thread:$0]  %s17_s14, 512, %s19_s16, [#allocation3], %s195_s17, %s195_s17, %s196_s18  }
   0x5   :  { %190 = dma.done.wait [#allocation3], 512  }
   0x6   :  { %191 = vsyncadd [#allocation3], 4294966784  ;;  %v197_v0 = vmov 0   ;;  %v32_v1 = vld [vmem:[%s239_s0 + $0x8] sm:$0xff]  ;;  %v36_v2 = vld [vmem:[#allocation2 + $0x18] sm:$0xff]  ;;  %v37_v7 = vlaneseq  ;;  %vm51_vm0 = vcmask 261120  }
   0x7   :  { %140 = vset.pattern.permute.xlu0 %v197_v0  ;;  %130 = vmatpush.msra.mxu1 %v36_v2  ;;  %v35_v3 = vld [vmem:[#allocation2 + $0x10] sm:$0xff]  ;;  %v34_v4 = vld [vmem:[#allocation2 + $0x8] sm:$0xff]  ;;  %v31_v5 = vld [vmem:[%s239_s0] sm:$0xff]  ;;  %v198_v10 = vmov 0.0   ;;  %s199_s23 = smov [#allocation5]   ;;  %s116_s27 = sshll.u32 %s242_s3, 4  ;;  %s117_s27 = int_to_ptr.hbm [resolvable:$true] %s116_s27 }
   0x8   :  { %43 = vperm.xlu0 %140, %v32_v1   ;;  %70 = vmatpush.msra.mxu0 %v36_v2  ;;  %v33_v6 = vld [vmem:[#allocation2] sm:$0xff]  ;;  %v38_v8 = vand.u32 127, %v37_v7  ;;  %s114_s24 = sshll.u32 %s199_s23, 4  ;;  %vm104_vm3 = vcmask 1041409   ;;  %vm107_vm4 = vcmask 254976   ;;  %s115_s24 = int_to_ptr.vmem [resolvable:$true] %s114_s24 }
   0x9   :  { %131 = vmatpush.msra.mxu1 %v35_v3  ;;  %v141_v26 = vld [vmem:[%s241_s2] ss:$0 sm:$0xff] }
   0xa   :  { %71 = vmatpush.msra.mxu0 %v35_v3 }
   0xb   :  { %132 = vmatpush.msra.mxu1 %v34_v4 }
   0xc   :  { %72 = vmatpush.msra.mxu0 %v34_v4 }
   0xd   :  { %133 = vmatpush.msra.mxu1 %v33_v6 }
   0xe   :  { %73 = vmatpush.msra.mxu0 %v33_v6 }
  0x10   :  { %40 = vperm.xlu0 %140, %v31_v5  }
  0x7a   :  { %v44_v9 = vpop.permute.xlu0 %43 }
  0x7b   :  { %vm46_vm1 = vcmp.eq.s32.totalorder %v44_v9, %v38_v8 }
  0x7c   :  { %v127_v11 = vsel %vm46_vm1, 1.0, %v198_v10 }
  0x7d   :  { %129 = vmatmul.msk.f32.vlgmr.msra.gmra.mxu1 %vm51_vm0, %v127_v11 }
  0x82   :  { %v41_v12 = vpop.permute.xlu0 %40 }
  0x83   :  { %vm45_vm2 = vcmp.eq.s32.totalorder %v41_v12, %v38_v8 }
  0x84   :  { %v126_v13 = vsel %vm45_vm2, 1.0, %v198_v10 }
  0x85   :  { %128 = vmatmul.msk.f32.vlgmr.msra.gmra.mxu0 %vm51_vm0, %v126_v13 }
  0xfa   :  { %v78_v14 = vpop.f32.mrf.mxu1 }
  0xfb   :  { %v88_v15 = vsel %vm51_vm0, %v78_v14, -inf }
  0xfc   :  { %v89_v16 = vrot.slane %v88_v15, 4 }
  0xfe   :  { %v90_v17 = vmax.f32 %v88_v15, %v89_v16 }
 0x100   :  { %v91_v18 = vrot.slane %v90_v17, 2 }
 0x102   :  { %v92_v19 = vmax.f32 %v90_v17, %v91_v18  ;;  %v75_v20 = vpop.f32.mrf.mxu0 }
 0x103   :  { %v81_v21 = vsel %vm51_vm0, %v75_v20, -inf }
 0x104   :  { %v93_v22 = vrot.slane %v92_v19, 1  ;;  %v82_v23 = vrot.slane %v81_v21, 4 }
 0x106   :  { %v83_v24 = vmax.f32 %v81_v21, %v82_v23  ;;  %v94_v25 = vmax.f32 %v92_v19, %v93_v22 }
 0x108   :  { %v84_v27 = vrot.slane %v83_v24, 2  ;;  %v100_v29 = vadd.f32 %v141_v26, %v94_v25 }
 0x10a   :  { %v85_v28 = vmax.f32 %v83_v24, %v84_v27  ;;  %v103_v32 = vrot.slane %v100_v29, 7 }
 0x10c   :  { %v86_v30 = vrot.slane %v85_v28, 1 }
 0x10e   :  { %v87_v31 = vmax.f32 %v85_v28, %v86_v30 }
 0x110   :  { %v99_v33 = vadd.f32 %v141_v26, %v87_v31 }
 0x112   :  { %v105_v34 = vsel %vm104_vm3, %v103_v32, %v99_v33 }
 0x113   :  { %108 = vst.msk [vmem:[#allocation5] sm:$0x3] %vm107_vm4, %v105_v34 }
 0x114   :  { %119 = dma.vmem_to_hbm [thread:$0]  %s115_s24, 32, %s117_s27, [#allocation4]  }
 0x115   :  { %192 = dma.done.wait [#allocation4], 32  }
 0x116   :  { %193 = vsyncadd [#allocation4], 4294967264 }
 0x117   :  { %124 = vsyncpa [#allocation3], 1 }
 0x118   :  { %125 = vsyncpa [#allocation4], 1 }

</bundles_post_ra>
